<compile_context>
chip_gen: v7x
topology: tpu7x:2x2x1
jax: 0.10.0
libtpu: 0.0.40
codegen_flags: <defaults>
</compile_context>

<pallas_src>
import jax
import jax.numpy as jnp
from jax.experimental import pallas as pl
from jax.experimental.pallas import tpu as pltpu


def tower_rerank_kernel(x_ref, w_ref, b_ref, o_ref):
    """One grid step processes a (TB, S, D) slab of the batch.

    x_ref: (TB, S, D) VMEM   input activations
    w_ref: (1, D)     VMEM   Linear weight, lane-major (D on the 128-lane axis)
    b_ref: (1,)       SMEM   Linear bias (scalar)
    o_ref: (TB, S)    VMEM   softmax probabilities, lane-dense (S on lanes)
    """
    x = x_ref[...].astype(jnp.float32)          # (TB, S, D)
    w = w_ref[...].astype(jnp.float32)          # (1, D) -> broadcasts over (TB, S, D)
    b = b_ref[0]                                # scalar read from SMEM

    # Linear(d_model -> 1): logits[t, s] = sum_d x[t, s, d] * w[d] + b
    # VPU multiply + lane reduce keeps the result lane-dense in S, avoiding a
    # narrow (TB*S, 1) intermediate and the layout shuffle that would follow.
    logits = jnp.sum(x * w, axis=-1) + b        # (TB, S), f32

    # Softmax over the sequence axis (== dim=1 of the (B, S, 1) PyTorch output).
    m = jnp.max(logits, axis=-1, keepdims=True)
    e = jnp.exp(logits - m)
    denom = jnp.sum(e, axis=-1, keepdims=True)
    o_ref[...] = (e * pl.reciprocal(denom)).astype(o_ref.dtype)


def _choose_batch_tile(B, S, D, itemsize, budget_bytes=4 << 20):
    """Pick the batch tile TB.

    Constraints:
      * B % TB == 0
      * the (TB, S) output block obeys the (8, 128) block rule:
        TB % 8 == 0 or TB == B
      * double-buffered x slabs (2 * TB * S * D * itemsize) stay well inside the
        scoped VMEM limit on all generations (v5e 16 MiB default included).
      * keep >= 2 grid steps when possible so megacore chips split the work.
    """
    per_batch = max(1, S * D * itemsize)
    max_tb = max(1, budget_bytes // per_batch)
    best = None
    tb = 8
    while tb <= min(B // 2, max_tb):
        if B % tb == 0:
            best = tb
        tb += 8
    if best is None:
        # Small / oddly-sized batch: one slab for the whole batch.
        # TODO(synk): for very large S*D (slab > VMEM budget) add a D-axis
        # "arbitrary" reduction grid dim with a logits accumulator in scratch.
        best = B
    return best


def tower_rerank(x, w, b, *, batch_tile=None):
    """x: (B, S, D); w: (1, D) (PyTorch nn.Linear weight layout); b: (1,).

    Returns (B, S, 1) = softmax over S of (x @ w.T + b), matching TowerRerank.
    """
    B, S, D = x.shape
    assert w.shape == (1, D) and b.shape == (1,)

    tb = batch_tile if batch_tile is not None else _choose_batch_tile(
        B, S, D, x.dtype.itemsize)
    assert B % tb == 0, (B, tb)
    grid_b = B // tb

    x_spec_kwargs = {}
    if grid_b >= 3:
        # Deeper input pipelining to hide DMA issue latency on long batch streams.
        x_spec_kwargs["pipeline_mode"] = pl.Buffered(3)

    out2d = pl.pallas_call(
        tower_rerank_kernel,
        out_shape=jax.ShapeDtypeStruct((B, S), x.dtype),
        grid_spec=pltpu.PrefetchScalarGridSpec(
            num_scalar_prefetch=0,
            grid=(grid_b,),
            in_specs=[
                # Batch-tiled activation slab.
                pl.BlockSpec((tb, S, D), lambda i: (i, 0, 0), **x_spec_kwargs),
                # Weight, full array, lane-major (D on lanes), resident every step.
                pl.BlockSpec((1, D), lambda i: (0, 0)),
                # Bias scalar kept in SMEM (scalar path, no vreg broadcast DMA).
                pl.BlockSpec(memory_space=pltpu.MemorySpace.SMEM),
            ],
            # Lane-dense output tile: S on the 128-lane axis.
            out_specs=pl.BlockSpec((tb, S), lambda i: (i, 0)),
        ),
        compiler_params=pltpu.CompilerParams(
            dimension_semantics=("parallel",),
        ),
    )(x, w, b)

    # Reshape to the PyTorch output layout (B, S, 1) outside the kernel so the
    # in-kernel store stays lane-dense.
    return out2d[..., None]


def tower_rerank_ref(x, w, b):
    logits = jnp.einsum("bsd,od->bso", x, w) + b  # (B, S, 1)
    return jax.nn.softmax(logits, axis=1)


def _make_inputs(key, B, S, D):
    kx, kw, kb = jax.random.split(key, 3)
    x = jax.random.normal(kx, (B, S, D), dtype=jnp.float32)
    # Deterministic parameter init (mimics nn.Linear's uniform(-1/sqrt(D), 1/sqrt(D))),
    # in PyTorch's weight layout: (out_features=1, in_features=D), bias (1,).
    bound = 1.0 / jnp.sqrt(jnp.float32(D))
    w = jax.random.uniform(kw, (1, D), minval=-bound, maxval=bound, dtype=jnp.float32)
    b = jax.random.uniform(kb, (1,), minval=-bound, maxval=bound, dtype=jnp.float32)
    return x, w, b


if __name__ == "__main__":
    key = jax.random.PRNGKey(0)
    k1, k2 = jax.random.split(key)

    # Case 1: small module-spec shapes (batch=2, seq=8, d_model=32), single tile.
    B, S, D = 2, 8, 32
    x, w, b = _make_inputs(k1, B, S, D)
    out = jax.block_until_ready(tower_rerank(x, w, b))
    ref = tower_rerank_ref(x, w, b)
    assert out.shape == (B, S, 1)
    assert jnp.allclose(out, ref, atol=1e-5, rtol=1e-5), "mismatch vs reference (small)"

    # Case 2: exercise the batch-tiled grid (grid_b=4) and deeper buffering path.
    B2, S2, D2 = 32, 128, 64
    x2, w2, b2 = _make_inputs(k2, B2, S2, D2)
    out2 = jax.block_until_ready(tower_rerank(x2, w2, b2, batch_tile=8))
    ref2 = tower_rerank_ref(x2, w2, b2)
    assert out2.shape == (B2, S2, 1)
    assert jnp.allclose(out2, ref2, atol=1e-5, rtol=1e-5), "mismatch vs reference (tiled)"

    print("KERNEL_OK")
</pallas_src>

<mosaic_0001>
module attributes {stable_mosaic.version = 11 : i64} {
  func.func @tower_rerank_kernel(%arg0: i32, %arg1: memref<2x8x32xf32, #tpu.memory_space<vmem>>, %arg2: memref<1x32xf32, #tpu.memory_space<vmem>>, %arg3: memref<1xf32, #tpu.memory_space<smem>>, %arg4: memref<2x8xf32, #tpu.memory_space<vmem>>) attributes {dimension_semantics = [#tpu.dimension_semantics<parallel>], iteration_bounds = array<i64: 1>, scalar_prefetch = 0 : i64, scratch_operands = 0 : i64, tpu.core_type = #tpu.core_type<tc>, window_params = [{transform_indices = @transform_0, window_bounds = array<i64: 2, 8, 32>}, {pipeline_mode = #tpu.pipeline_mode<synchronous>, transform_indices = @transform_1, window_bounds = array<i64: 1, 32>}, {transform_indices = @transform_2, window_bounds = array<i64: 1>}, {transform_indices = @transform_3, window_bounds = array<i64: 2, 8>}]} {
    %c0 = arith.constant 0 : index
    %c0_0 = arith.constant 0 : index
    %c0_1 = arith.constant 0 : index
    %0 = vector.load %arg1[%c0, %c0_0, %c0_1] : memref<2x8x32xf32, #tpu.memory_space<vmem>>, vector<2x8x32xf32>
    %c0_2 = arith.constant 0 : index
    %c0_3 = arith.constant 0 : index
    %1 = vector.load %arg2[%c0_2, %c0_3] : memref<1x32xf32, #tpu.memory_space<vmem>>, vector<1x32xf32>
    %c0_4 = arith.constant 0 : index
    %2 = memref.load %arg3[%c0_4] : memref<1xf32, #tpu.memory_space<smem>>
    %3 = vector.shape_cast %1 : vector<1x32xf32> to vector<1x1x32xf32>
    %4 = vector.broadcast %3 : vector<1x1x32xf32> to vector<2x8x32xf32>
    %5 = arith.mulf %0, %4 : vector<2x8x32xf32>
    %cst = arith.constant dense<0.000000e+00> : vector<2x8xf32>
    %6 = vector.multi_reduction <add>, %5, %cst [2] : vector<2x8x32xf32> to vector<2x8xf32>
    %7 = vector.broadcast %2 : f32 to vector<2x8xf32>
    %8 = arith.addf %6, %7 : vector<2x8xf32>
    %cst_5 = arith.constant dense<0xFF800000> : vector<2xf32>
    %9 = vector.multi_reduction <maximumf>, %8, %cst_5 [1] : vector<2x8xf32> to vector<2xf32>
    %10 = vector.shape_cast %9 : vector<2xf32> to vector<2x1xf32>
    %11 = vector.broadcast %10 : vector<2x1xf32> to vector<2x8xf32>
    %12 = arith.subf %8, %11 : vector<2x8xf32>
    %13 = math.exp %12 : vector<2x8xf32>
    %cst_6 = arith.constant dense<0.000000e+00> : vector<2xf32>
    %14 = vector.multi_reduction <add>, %13, %cst_6 [1] : vector<2x8xf32> to vector<2xf32>
    %15 = vector.shape_cast %14 : vector<2xf32> to vector<2x1xf32>
    %16 = tpu.reciprocal %15 : vector<2x1xf32> -> vector<2x1xf32>
    %17 = vector.broadcast %16 : vector<2x1xf32> to vector<2x8xf32>
    %18 = arith.mulf %13, %17 : vector<2x8xf32>
    %c0_7 = arith.constant 0 : index
    %c0_8 = arith.constant 0 : index
    %19 = vector.load %arg4[%c0_7, %c0_8] : memref<2x8xf32, #tpu.memory_space<vmem>>, vector<2x8xf32>
    tpu.vector_store %arg4[%c0_7, %c0_8], %18 {strides = array<i32>} : memref<2x8xf32, #tpu.memory_space<vmem>>, vector<2x8xf32>,
    return
  }
  func.func @transform_0(%arg0: i32) -> (i32, i32, i32) {
    %c0_i32 = arith.constant 0 : i32
    %c0_i32_0 = arith.constant 0 : i32
    %c0_i32_1 = arith.constant 0 : i32
    return %arg0, %c0_i32, %c0_i32_0 : i32, i32, i32
  }
  func.func @transform_1(%arg0: i32) -> (i32, i32) {
    %c0_i32 = arith.constant 0 : i32
    %c0_i32_0 = arith.constant 0 : i32
    %c0_i32_1 = arith.constant 0 : i32
    return %c0_i32, %c0_i32_0 : i32, i32
  }
  func.func @transform_2(%arg0: i32) -> i32 {
    %c0_i32 = arith.constant 0 : i32
    %c0_i32_0 = arith.constant 0 : i32
    return %c0_i32 : i32
  }
  func.func @transform_3(%arg0: i32) -> (i32, i32) {
    %c0_i32 = arith.constant 0 : i32
    %c0_i32_0 = arith.constant 0 : i32
    return %arg0, %c0_i32 : i32, i32
  }
}

</mosaic_0001>

<bundles_post_ra>
// kernel: tpu_custom_call.1
= control target key start
LH: loop header
LB: loop body
LE: loop exit
PB: predicated region body
PF: predicated region fallthrough
CT: control target
= control target key end

     0   :  { %9 = vsyncpa [#allocation4], 0  ;;  %s280_s0 = inlined_call_operand.hbm [shape: f32[2,8,32], index: 0, kind: input, shape index: {}]   ;;  %s281_s1 = inlined_call_operand.vmem [shape: f32[1,32], index: 1, kind: input, shape index: {}]   ;;  %s282_s2 = inlined_call_operand.<no memory space> [shape: f32[1], index: 2, kind: input, shape index: {}]   ;;  %s283_s3 = inlined_call_operand.hbm [shape: f32[2,8], index: 3, kind: output, shape index: {}]  }
   0x1   :  { %10 = vsyncpa [#allocation5], 0  ;;  %s219_s12 = smov [#allocation3]   ;;  %s171_s16 = scalar_lea.hbm %s280_s0, 256 }
   0x2   :  { %s16_s13 = sshll.u32 %s219_s12, 4  ;;  %p172_p0 = scmp.ne.s32.totalorder %s280_s0, %s171_s16  ;;  %s17_s13 = int_to_ptr.vmem [resolvable:$true] %s16_s13 }
   0x3   :  { %p175_p1 = scmp.lt.u32.totalorder %s171_s16, %s280_s0 }
   0x5   :  { %p177_p2 = pnand %p175_p1, %p172_p0 }
   0x7   :  { %180 = shalt.err (!%p177_p2)
}
   0x8   :  { %s181_s21 = scalar_lea.vmem %s17_s13, 256  ;;  %p186_p4 = scmp.lt.s32.totalorder %s17_s13, %s17_s13 }
   0x9   :  { %p182_p3 = scmp.ne.s32.totalorder %s17_s13, %s181_s21  ;;  %p187_p5 = scmp.lt.s32.totalorder %s181_s21, %s181_s21 }
   0xb   :  { %p188_p6 = por %p187_p5, %p186_p4 }
   0xd   :  { %p189_p7 = pnand %p188_p6, %p182_p3 }
   0xf   :  { %192 = shalt.err (!%p189_p7)
}
  0x10   :  { %s220_s22 = smov 128   ;;  %s221_s23 = smov 8  }
  0x11   :  { %22 = dma.hbm_to_vmem [thread:$0]  %s280_s0, 256, %s17_s13, [#allocation4], %s220_s22, %s220_s22, %s221_s23  }
  0x12   :  { %215 = dma.done.wait [#allocation4], 256  }
  0x13   :  { %216 = vsyncadd [#allocation4], 4294967040  ;;  %v30_v0 = vld [vmem:[#allocation3] sm:$0xff]  ;;  %vm42_vm0 = vcmask 261120   ;;  %v31_v2 = vld [vmem:[#allocation3 + $0x8] sm:$0xff]  ;;  %v54_v7 = vlaneseq  ;;  %v49_v10 = vstv %s282_s2  ;;  %vm64_vm1 = vcmask 1041409  }
  0x14   :  { %v157_v1 = vld [vmem:[%s281_s1] ss:$0 sm:$0xff]  ;;  %vm67_vm2 = vcmask 58368   ;;  %v222_v20 = vmov 0   ;;  %s223_s1 = smov [#allocation6]  }
  0x15   :  { %v40_v3 = vmul.f32 %v157_v1, %v30_v0  ;;  %v41_v4 = vmul.f32 %v157_v1, %v31_v2  ;;  %v55_v8 = vand.u32 127, %v54_v7  ;;  %v57_v9 = vshrl.u32 %v54_v7, 7  ;;  %164 = vset.pattern.permute.xlu0 %v222_v20  ;;  %163 = vset.pattern.permute.xlu1 %v222_v20  ;;  %s148_s2 = sshll.u32 %s223_s1, 4  ;;  %s149_s2 = int_to_ptr.vmem [resolvable:$true] %s148_s2 }
  0x16   :  { %s193_s29 = scalar_lea.vmem %s149_s2, 32  ;;  %p198_p9 = scmp.lt.s32.totalorder %s149_s2, %s149_s2 }
  0x17   :  { %v43_v5 = vsel %vm42_vm0, %v40_v3, 0.0  ;;  %v46_v6 = vsel %vm42_vm0, %v41_v4, 0.0  ;;  %v58_v12 = vsub.s32 %v55_v8, %v57_v9  ;;  %v74_v21 = vsub.s32 0, %v57_v9  ;;  %p194_p8 = scmp.ne.s32.totalorder %s149_s2, %s193_s29  ;;  %p199_p10 = scmp.lt.s32.totalorder %s193_s29, %s193_s29 }
  0x18   :  { %44 = vadd.xlane.f32.xlu0 %v43_v5  ;;  %v78_v22 = vsub.s32 1, %v57_v9 }
  0x19   :  { %p200_p11 = por %p199_p10, %p198_p9 }
  0x1b   :  { %p201_p12 = pnand %p200_p11, %p194_p8 }
  0x1c   :  { %47 = vadd.xlane.f32.xlu0 %v46_v6 }
  0xa5   :  { %v45_v11 = vpop.xlane.xlu0 %44 }
  0xa6   :  { %v50_v13 = vadd.f32 %v49_v10, %v45_v11 }
  0xa8   :  { %v59_v16 = vrot.slane %v50_v13, %v58_v12 }
  0xa9   :  { %v48_v14 = vpop.xlane.xlu0 %47 }
  0xaa   :  { %v51_v15 = vadd.f32 %v49_v10, %v48_v14 }
  0xac   :  { %v63_v17 = vrot.slane %v51_v15, %v58_v12 }
  0xae   :  { %v65_v18 = vsel %vm64_vm1, %v63_v17, %v59_v16 }
  0xaf   :  { %v68_v19 = vsel %vm67_vm2, %v65_v18, -inf }
  0xb0   :  { %69 = vmax.xlane.f32.xlu1 %v68_v19 }
 0x13d   :  { %v70_v23 = vpop.xlane.xlu1 %69 }
 0x13e   :  { %v75_v24 = vrot.slane %v70_v23, %v74_v21  ;;  %v79_v25 = vrot.slane %v70_v23, %v78_v22 }
 0x140   :  { %v82_v26 = vsub.f32 %v50_v13, %v75_v24  ;;  %v83_v27 = vsub.f32 %v51_v15, %v79_v25 }
 0x142   :  { %v84_v28 = vmul.f32 1.442695, %v82_v26  ;;  %v86_v29 = vmul.f32 1.442695, %v83_v27 }
 0x144   :  { %165 = vpow2.f32 %v84_v28 }
 0x145   :  { %167 = vpow2.f32 %v86_v29 }
 0x14e   :  { %v166_v30 = vpop.eup %165 }
 0x14f   :  { %v168_v31 = vpop.eup %167  ;;  %91 = vperm.xlu1 %163, %v166_v30  }
 0x150   :  { %94 = vperm.xlu0 %164, %v168_v31  }
 0x1ce   :  { %v92_v32 = vpop.permute.xlu1 %91 }
 0x1cf   :  { %v95_v33 = vpop.permute.xlu0 %94  ;;  %v99_v34 = vrot.slane %v92_v32, %v58_v12 }
 0x1d0   :  { %v103_v35 = vrot.slane %v95_v33, %v58_v12 }
 0x1d2   :  { %v104_v36 = vsel %vm64_vm1, %v103_v35, %v99_v34 }
 0x1d3   :  { %v106_v37 = vsel %vm67_vm2, %v104_v36, 0.0 }
 0x1d4   :  { %107 = vadd.xlane.f32.xlu1 %v106_v37 }
 0x261   :  { %v108_v38 = vpop.xlane.xlu1 %107 }
 0x262   :  { %169 = vrcp.f32 %v108_v38 }
 0x26c   :  { %v170_v39 = vpop.eup %169 }
 0x26d   :  { %v114_v40 = vrot.slane %v170_v39, %v74_v21  ;;  %v118_v42 = vrot.slane %v170_v39, %v78_v22 }
 0x26f   :  { %v121_v41 = vmul.f32 %v166_v30, %v114_v40  ;;  %v122_v43 = vmul.f32 %v168_v31, %v118_v42 }
 0x271   :  { %126 = vperm.xlu0 %164, %v121_v41  }
 0x275   :  { %129 = vperm.xlu0 %164, %v122_v43  }
 0x2f0   :  { %v127_v44 = vpop.permute.xlu0 %126 }
 0x2f1   :  { %v134_v46 = vrot.slane %v127_v44, %v58_v12 }
 0x2f4   :  { %v130_v45 = vpop.permute.xlu0 %129 }
 0x2f5   :  { %v138_v47 = vrot.slane %v130_v45, %v58_v12 }
 0x2f7   :  { %v139_v48 = vsel %vm64_vm1, %v138_v47, %v134_v46 }
 0x2f8   :  { %141 = vst.msk [vmem:[#allocation6] sm:$0x3] %vm67_vm2, %v139_v48 }
 0x2f9   :  { %204 = shalt.err (!%p201_p12)
}
 0x2fa   :  { %s205_s5 = scalar_lea.hbm %s283_s3, 32 }
 0x2fb   :  { %p206_p13 = scmp.ne.s32.totalorder %s283_s3, %s205_s5  ;;  %p209_p0 = scmp.lt.u32.totalorder %s205_s5, %s283_s3 }
 0x2fd   :  { %p211_p1 = pnand %p209_p0, %p206_p13 }
 0x2ff   :  { %214 = shalt.err (!%p211_p1)
}
 0x300   :  { %151 = dma.vmem_to_hbm [thread:$0]  %s149_s2, 32, %s283_s3, [#allocation5]  }
 0x301   :  { %217 = dma.done.wait [#allocation5], 32  }
 0x302   :  { %218 = vsyncadd [#allocation5], 4294967264 }
 0x303   :  { %155 = vsyncpa [#allocation4], 1 }
 0x304   :  { %156 = vsyncpa [#allocation5], 1 }

</bundles_post_ra>
